<compile_context>
chip_gen: v6e
topology: v6e:2x2x1
jax: 0.10.0
libtpu: 0.0.40
codegen_flags: <defaults>
</compile_context>

<pallas_src>
import functools

import jax
import jax.numpy as jnp
from jax.experimental import pallas as pl
from jax.experimental.pallas import tpu as pltpu

C_IN, C_OUT, K = 1, 2, 2
NTAP = C_IN * K * K * K          # 8 taps per output channel
LANES = 128                      # one vreg of lanes


def _conv3d_relu6_kernel(x_ref, w_ref, b_ref, o_ref, *, sd, sh):
    # x_ref: VMEM (1, 128) f32       -- flattened 5x5x5 volume in lanes 0..124
    # w_ref: SMEM (C_OUT*NTAP,) f32  -- flattened (oc, ic, kd, kh, kw)
    # b_ref: SMEM (C_OUT,) f32
    # o_ref: VMEM (C_OUT, 128) f32   -- row c = channel c, 5x5x5 lane layout
    x = x_ref[...]                                   # single (1,128) load

    # In-kernel im2col: the 8 tap-aligned vectors via lane rotations (XLU slot).
    taps = []
    for kd in range(K):
        for kh in range(K):
            for kw in range(K):
                s = kd * sd + kh * sh + kw
                taps.append(
                    x if s == 0
                    else pltpu.roll(x, shift=(LANES - s) % LANES, axis=1))

    # Hoist all SMEM scalar reads before the vector FMA loop.
    w = [[w_ref[c * NTAP + t] for t in range(NTAP)] for c in range(C_OUT)]
    bias = [b_ref[c] for c in range(C_OUT)]

    for c in range(C_OUT):
        acc = jnp.full((1, LANES), bias[c], dtype=jnp.float32)
        for t in range(NTAP):                        # 8 broadcast-FMAs / channel (VPU)
            acc = acc + w[c][t] * taps[t]
        # ReLU6 + direct lane-dense row store (no sublane concatenate).
        o_ref[c:c + 1, :] = jnp.clip(acc, 0.0, 6.0)


@jax.jit
def conv3d_relu6(x, w, b):
    N, Ci, D, H, W = x.shape
    assert N == 1 and Ci == C_IN
    Do, Ho, Wo = D - K + 1, H - K + 1, W - K + 1
    P = D * H * W
    assert P <= LANES

    # Pad the whole volume into one lane-dense vector (fused under jit).
    x_lanes = jnp.pad(x.reshape(-1).astype(jnp.float32),
                      (0, LANES - P)).reshape(1, LANES)
    w_flat = w.reshape(-1).astype(jnp.float32)       # (C_OUT*NTAP,) = (16,)
    b = b.astype(jnp.float32)

    kernel = functools.partial(_conv3d_relu6_kernel, sd=H * W, sh=W)
    out_slab = pl.pallas_call(
        kernel,
        out_shape=jax.ShapeDtypeStruct((C_OUT, LANES), jnp.float32),
        in_specs=[
            pl.BlockSpec(memory_space=pltpu.MemorySpace.VMEM),   # input volume in lanes
            pl.BlockSpec(memory_space=pltpu.MemorySpace.SMEM),   # flattened weights
            pl.BlockSpec(memory_space=pltpu.MemorySpace.SMEM),   # bias
        ],
        out_specs=pl.BlockSpec(memory_space=pltpu.MemorySpace.VMEM),
    )(x_lanes, w_flat, b)

    # TODO(synk): if this op is ever run over a real batch, pack 2 samples per
    # vreg along lanes and add a "parallel" grid axis over batch (v7x 2-TC).
    out = out_slab[:, :P].reshape(C_OUT, D, H, W)[:, :Do, :Ho, :Wo]
    return out[None]                                  # (1, C_OUT, Do, Ho, Wo)


def _reference(x, w, b):
    # Pure-JAX reference for sanity checking.
    y = jax.lax.conv_general_dilated(
        x, w, window_strides=(1, 1, 1), padding="VALID",
        dimension_numbers=("NCDHW", "OIDHW", "NCDHW"))
    y = y + b.reshape(1, C_OUT, 1, 1, 1)
    return jnp.clip(y, 0.0, 6.0)


if __name__ == "__main__":
    key = jax.random.PRNGKey(0)
    kx, kw, kb = jax.random.split(key, 3)

    # Input matches the PyTorch script: torch.randn(1, 1, 5, 5, 5)
    x = jax.random.normal(kx, (1, C_IN, 5, 5, 5), dtype=jnp.float32)

    # Deterministic Conv3d-style init: U(-1/sqrt(fan_in), 1/sqrt(fan_in))
    fan_in = C_IN * K * K * K
    bound = 1.0 / (fan_in ** 0.5)
    w = jax.random.uniform(kw, (C_OUT, C_IN, K, K, K), jnp.float32, -bound, bound)
    b = jax.random.uniform(kb, (C_OUT,), jnp.float32, -bound, bound)

    out = jax.block_until_ready(conv3d_relu6(x, w, b))
    ref = _reference(x, w, b)

    assert out.shape == (1, C_OUT, 4, 4, 4)
    assert jnp.allclose(out, ref, atol=1e-5, rtol=1e-5)
    print("KERNEL_OK")
</pallas_src>

<mosaic_0001>
module attributes {stable_mosaic.version = 11 : i64} {
  func.func @_conv3d_relu6_kernel(%arg0: memref<1x128xf32, #tpu.memory_space<vmem>>, %arg1: memref<16xf32, #tpu.memory_space<smem>>, %arg2: memref<2xf32, #tpu.memory_space<smem>>, %arg3: memref<2x128xf32, #tpu.memory_space<vmem>>) attributes {dimension_semantics = [], scalar_prefetch = 0 : i64, scratch_operands = 0 : i64, tpu.core_type = #tpu.core_type<tc>} {
    %c0 = arith.constant 0 : index
    %c0_0 = arith.constant 0 : index
    %0 = vector.load %arg0[%c0, %c0_0] : memref<1x128xf32, #tpu.memory_space<vmem>>, vector<1x128xf32>
    %c127_i32 = arith.constant 127 : i32
    %1 = tpu.dynamic_rotate %0 by %c127_i32 dim 1 : vector<1x128xf32>, i32 -> vector<1x128xf32>
    %c123_i32 = arith.constant 123 : i32
    %2 = tpu.dynamic_rotate %0 by %c123_i32 dim 1 : vector<1x128xf32>, i32 -> vector<1x128xf32>
    %c122_i32 = arith.constant 122 : i32
    %3 = tpu.dynamic_rotate %0 by %c122_i32 dim 1 : vector<1x128xf32>, i32 -> vector<1x128xf32>
    %c103_i32 = arith.constant 103 : i32
    %4 = tpu.dynamic_rotate %0 by %c103_i32 dim 1 : vector<1x128xf32>, i32 -> vector<1x128xf32>
    %c102_i32 = arith.constant 102 : i32
    %5 = tpu.dynamic_rotate %0 by %c102_i32 dim 1 : vector<1x128xf32>, i32 -> vector<1x128xf32>
    %c98_i32 = arith.constant 98 : i32
    %6 = tpu.dynamic_rotate %0 by %c98_i32 dim 1 : vector<1x128xf32>, i32 -> vector<1x128xf32>
    %c97_i32 = arith.constant 97 : i32
    %7 = tpu.dynamic_rotate %0 by %c97_i32 dim 1 : vector<1x128xf32>, i32 -> vector<1x128xf32>
    %c0_1 = arith.constant 0 : index
    %8 = memref.load %arg1[%c0_1] : memref<16xf32, #tpu.memory_space<smem>>
    %c1 = arith.constant 1 : index
    %9 = memref.load %arg1[%c1] : memref<16xf32, #tpu.memory_space<smem>>
    %c2 = arith.constant 2 : index
    %10 = memref.load %arg1[%c2] : memref<16xf32, #tpu.memory_space<smem>>
    %c3 = arith.constant 3 : index
    %11 = memref.load %arg1[%c3] : memref<16xf32, #tpu.memory_space<smem>>
    %c4 = arith.constant 4 : index
    %12 = memref.load %arg1[%c4] : memref<16xf32, #tpu.memory_space<smem>>
    %c5 = arith.constant 5 : index
    %13 = memref.load %arg1[%c5] : memref<16xf32, #tpu.memory_space<smem>>
    %c6 = arith.constant 6 : index
    %14 = memref.load %arg1[%c6] : memref<16xf32, #tpu.memory_space<smem>>
    %c7 = arith.constant 7 : index
    %15 = memref.load %arg1[%c7] : memref<16xf32, #tpu.memory_space<smem>>
    %c8 = arith.constant 8 : index
    %16 = memref.load %arg1[%c8] : memref<16xf32, #tpu.memory_space<smem>>
    %c9 = arith.constant 9 : index
    %17 = memref.load %arg1[%c9] : memref<16xf32, #tpu.memory_space<smem>>
    %c10 = arith.constant 10 : index
    %18 = memref.load %arg1[%c10] : memref<16xf32, #tpu.memory_space<smem>>
    %c11 = arith.constant 11 : index
    %19 = memref.load %arg1[%c11] : memref<16xf32, #tpu.memory_space<smem>>
    %c12 = arith.constant 12 : index
    %20 = memref.load %arg1[%c12] : memref<16xf32, #tpu.memory_space<smem>>
    %c13 = arith.constant 13 : index
    %21 = memref.load %arg1[%c13] : memref<16xf32, #tpu.memory_space<smem>>
    %c14 = arith.constant 14 : index
    %22 = memref.load %arg1[%c14] : memref<16xf32, #tpu.memory_space<smem>>
    %c15 = arith.constant 15 : index
    %23 = memref.load %arg1[%c15] : memref<16xf32, #tpu.memory_space<smem>>
    %c0_2 = arith.constant 0 : index
    %24 = memref.load %arg2[%c0_2] : memref<2xf32, #tpu.memory_space<smem>>
    %c1_3 = arith.constant 1 : index
    %25 = memref.load %arg2[%c1_3] : memref<2xf32, #tpu.memory_space<smem>>
    %26 = vector.broadcast %24 : f32 to vector<1x128xf32>
    %27 = vector.broadcast %8 : f32 to vector<1x128xf32>
    %28 = arith.mulf %27, %0 : vector<1x128xf32>
    %29 = arith.addf %26, %28 : vector<1x128xf32>
    %30 = vector.broadcast %9 : f32 to vector<1x128xf32>
    %31 = arith.mulf %30, %1 : vector<1x128xf32>
    %32 = arith.addf %29, %31 : vector<1x128xf32>
    %33 = vector.broadcast %10 : f32 to vector<1x128xf32>
    %34 = arith.mulf %33, %2 : vector<1x128xf32>
    %35 = arith.addf %32, %34 : vector<1x128xf32>
    %36 = vector.broadcast %11 : f32 to vector<1x128xf32>
    %37 = arith.mulf %36, %3 : vector<1x128xf32>
    %38 = arith.addf %35, %37 : vector<1x128xf32>
    %39 = vector.broadcast %12 : f32 to vector<1x128xf32>
    %40 = arith.mulf %39, %4 : vector<1x128xf32>
    %41 = arith.addf %38, %40 : vector<1x128xf32>
    %42 = vector.broadcast %13 : f32 to vector<1x128xf32>
    %43 = arith.mulf %42, %5 : vector<1x128xf32>
    %44 = arith.addf %41, %43 : vector<1x128xf32>
    %45 = vector.broadcast %14 : f32 to vector<1x128xf32>
    %46 = arith.mulf %45, %6 : vector<1x128xf32>
    %47 = arith.addf %44, %46 : vector<1x128xf32>
    %48 = vector.broadcast %15 : f32 to vector<1x128xf32>
    %49 = arith.mulf %48, %7 : vector<1x128xf32>
    %50 = arith.addf %47, %49 : vector<1x128xf32>
    %cst = arith.constant 0.000000e+00 : f32
    %cst_4 = arith.constant 6.000000e+00 : f32
    %51 = vector.broadcast %cst : f32 to vector<1x128xf32>
    %52 = arith.maximumf %51, %50 : vector<1x128xf32>
    %53 = vector.broadcast %cst_4 : f32 to vector<1x128xf32>
    %54 = arith.minimumf %53, %52 : vector<1x128xf32>
    %c0_5 = arith.constant 0 : index
    %c0_6 = arith.constant 0 : index
    %55 = vector.load %arg3[%c0_5, %c0_6] : memref<2x128xf32, #tpu.memory_space<vmem>>, vector<1x128xf32>
    tpu.vector_store %arg3[%c0_5, %c0_6], %54 {strides = array<i32>} : memref<2x128xf32, #tpu.memory_space<vmem>>, vector<1x128xf32>,
    %56 = vector.broadcast %25 : f32 to vector<1x128xf32>
    %57 = vector.broadcast %16 : f32 to vector<1x128xf32>
    %58 = arith.mulf %57, %0 : vector<1x128xf32>
    %59 = arith.addf %56, %58 : vector<1x128xf32>
    %60 = vector.broadcast %17 : f32 to vector<1x128xf32>
    %61 = arith.mulf %60, %1 : vector<1x128xf32>
    %62 = arith.addf %59, %61 : vector<1x128xf32>
    %63 = vector.broadcast %18 : f32 to vector<1x128xf32>
    %64 = arith.mulf %63, %2 : vector<1x128xf32>
    %65 = arith.addf %62, %64 : vector<1x128xf32>
    %66 = vector.broadcast %19 : f32 to vector<1x128xf32>
    %67 = arith.mulf %66, %3 : vector<1x128xf32>
    %68 = arith.addf %65, %67 : vector<1x128xf32>
    %69 = vector.broadcast %20 : f32 to vector<1x128xf32>
    %70 = arith.mulf %69, %4 : vector<1x128xf32>
    %71 = arith.addf %68, %70 : vector<1x128xf32>
    %72 = vector.broadcast %21 : f32 to vector<1x128xf32>
    %73 = arith.mulf %72, %5 : vector<1x128xf32>
    %74 = arith.addf %71, %73 : vector<1x128xf32>
    %75 = vector.broadcast %22 : f32 to vector<1x128xf32>
    %76 = arith.mulf %75, %6 : vector<1x128xf32>
    %77 = arith.addf %74, %76 : vector<1x128xf32>
    %78 = vector.broadcast %23 : f32 to vector<1x128xf32>
    %79 = arith.mulf %78, %7 : vector<1x128xf32>
    %80 = arith.addf %77, %79 : vector<1x128xf32>
    %cst_7 = arith.constant 0.000000e+00 : f32
    %cst_8 = arith.constant 6.000000e+00 : f32
    %81 = vector.broadcast %cst_7 : f32 to vector<1x128xf32>
    %82 = arith.maximumf %81, %80 : vector<1x128xf32>
    %83 = vector.broadcast %cst_8 : f32 to vector<1x128xf32>
    %84 = arith.minimumf %83, %82 : vector<1x128xf32>
    %c1_9 = arith.constant 1 : index
    %c0_10 = arith.constant 0 : index
    %85 = vector.load %arg3[%c1_9, %c0_10] : memref<2x128xf32, #tpu.memory_space<vmem>>, vector<1x128xf32>
    tpu.vector_store %arg3[%c1_9, %c0_10], %84 {strides = array<i32>} : memref<2x128xf32, #tpu.memory_space<vmem>>, vector<1x128xf32>,
    return
  }
}

</mosaic_0001>

<bundles_post_ra>
// kernel: conv3d_relu6.1
= control target key start
LH: loop header
LB: loop body
LE: loop exit
PB: predicated region body
PF: predicated region fallthrough
CT: control target
= control target key end

     0   :  { %8 = vsyncpa [#allocation3], 0  ;;  %s267_s0 = inlined_call_operand.vmem [shape: f32[1,128], index: 0, kind: input, shape index: {}]   ;;  %s268_s1 = inlined_call_operand.vmem [shape: f32[16], index: 1, kind: input, shape index: {}]   ;;  %s269_s2 = inlined_call_operand.vmem [shape: f32[2], index: 2, kind: input, shape index: {}]   ;;  %s270_s3 = inlined_call_operand.vmem [shape: f32[2,128], index: 3, kind: output, shape index: {}]  }
   0x1   :  { %s18_s14 = sshll.u32 %s268_s1, 4  ;;  %s19_s14 = int_to_ptr.vmem [resolvable:$true] %s18_s14 }
   0x2   :  { %9 = vsyncpa [#allocation5], 0  ;;  %s28_s17 = sshll.u32 %s269_s2, 4  ;;  %s159_s18 = scalar_lea.vmem %s19_s14, 16  ;;  %s29_s17 = int_to_ptr.vmem [resolvable:$true] %s28_s17 }
   0x3   :  { %p160_p0 = scmp.ne.s32.totalorder %s19_s14, %s159_s18  ;;  %p164_p1 = scmp.lt.s32.totalorder %s19_s14, %s19_s14 }
   0x4   :  { %p165_p2 = scmp.lt.s32.totalorder %s159_s18, %s159_s18 }
   0x6   :  { %p166_p3 = por %p165_p2, %p164_p1 }
   0x8   :  { %p167_p4 = pnand %p166_p3, %p160_p0 }
   0xa   :  { %170 = shalt.err (!%p167_p4)
}
   0xb   :  { %s187_s19 = smov [#allocation2]   ;;  %s171_s20 = scalar_lea.vmem %s29_s17, 16 }
   0xc   :  { %21 = dma.vmem_to_smem %s19_s14, 16, %s187_s19, [#allocation3]  }
   0xd   :  { %p172_p5 = scmp.ne.s32.totalorder %s29_s17, %s171_s20  ;;  %p176_p6 = scmp.lt.s32.totalorder %s29_s17, %s29_s17 }
   0xe   :  { %p177_p7 = scmp.lt.s32.totalorder %s171_s20, %s171_s20 }
  0x10   :  { %p178_p8 = por %p177_p7, %p176_p6 }
  0x12   :  { %p179_p9 = pnand %p178_p8, %p172_p5 }
  0x14   :  { %182 = shalt.err (!%p179_p9)
}
  0x15   :  { %s188_s1 = smov [#allocation4]  }
  0x16   :  { %31 = dma.vmem_to_smem %s29_s17, 16, %s188_s1, [#allocation5]  }
  0x17   :  { %183 = dma.done.wait [#allocation3], 16  }
  0x18   :  { %184 = vsyncadd [#allocation3], 4294967280 }
  0x19   :  { %185 = dma.done.wait [#allocation5], 16  }
  0x1a   :  { %186 = vsyncadd [#allocation5], 4294967280 }
  0x1b   :  { %38 = sfence }
  0x1c   :  { %v39_v0 = vld [vmem:[%s267_s0] sm:$0x1]  ;;  %s189_s22 = smov 127   ;;  %s190_s23 = smov 122  }
  0x1d   :  { %40 = vrot.lane.b32.xlu0 %v39_v0, %s189_s22  ;;  %44 = vrot.lane.b32.xlu1 %v39_v0, %s190_s23  ;;  %s191_s24 = smov 123   ;;  %s192_s25 = smov 103  }
  0x1e   :  { %s193_s26 = smov 102   ;;  %s194_s27 = smov 98  }
  0x1f   :  { %s195_s28 = smov 97   ;;  %s54_s29 = sld [smem:[#allocation2]] }
  0x20   :  { %s141_s30 = sld [smem:[#allocation2 + $0x8]] }
  0x21   :  { %42 = vrot.lane.b32.xlu0 %v39_v0, %s191_s24  ;;  %46 = vrot.lane.b32.xlu1 %v39_v0, %s192_s25  ;;  %s134_s4 = sld [smem:[#allocation2 + $0x1]] }
  0x22   :  { %s142_s5 = sld [smem:[#allocation2 + $0x9]] }
  0x23   :  { %s70_s6 = sld [smem:[#allocation4]] }
  0x24   :  { %s149_s0 = sld [smem:[#allocation4 + $0x1]] }
  0x25   :  { %48 = vrot.lane.b32.xlu0 %v39_v0, %s193_s26  ;;  %50 = vrot.lane.b32.xlu1 %v39_v0, %s194_s27  ;;  %s225_s7 = sld [smem:[#allocation2 + $0x3]]  ;;  %v73_v1 = vstv %s54_s29 }
  0x26   :  { %s227_s8 = sld [smem:[#allocation2 + $0xb]]  ;;  %v101_v2 = vstv %s141_s30  ;;  %v74_v3 = vmul.f32 %v73_v1, %v39_v0 }
  0x27   :  { %s229_s9 = sld [smem:[#allocation2 + $0x2]]  ;;  %v102_v4 = vmul.f32 %v101_v2, %v39_v0  ;;  %v76_v6 = vstv %s134_s4 }
  0x28   :  { %s231_s10 = sld [smem:[#allocation2 + $0xa]]  ;;  %v104_v8 = vstv %s142_s5 }
  0x29   :  { %52 = vrot.lane.b32.xlu0 %v39_v0, %s195_s28  ;;  %s233_s11 = sld [smem:[#allocation2 + $0x4]]  ;;  %v72_v5 = vstv %s70_s6 }
  0x2a   :  { %s235_s12 = sld [smem:[#allocation2 + $0xc]]  ;;  %v100_v7 = vstv %s149_s0  ;;  %v75_v11 = vadd.f32 %v74_v3, %v72_v5 }
  0x2b   :  { %s237_s13 = sld [smem:[#allocation2 + $0x5]]  ;;  %v103_v13 = vadd.f32 %v102_v4, %v100_v7  ;;  %v82_v17 = vstv %s225_s7 }
  0x2c   :  { %s239_s14 = sld [smem:[#allocation2 + $0xd]]  ;;  %v110_v18 = vstv %s227_s8 }
  0x2d   :  { %s241_s15 = sld [smem:[#allocation2 + $0x6]]  ;;  %v79_v15 = vstv %s229_s9 }
  0x2e   :  { %s243_s16 = sld [smem:[#allocation2 + $0xe]]  ;;  %v107_v16 = vstv %s231_s10 }
  0x2f   :  { %s245_s17 = sld [smem:[#allocation2 + $0x7]]  ;;  %v85_v20 = vstv %s233_s11 }
  0x30   :  { %s249_s18 = sld [smem:[#allocation2 + $0xf]]  ;;  %v113_v21 = vstv %s235_s12 }
  0x31   :  { %v88_v29 = vstv %s237_s13 }
  0x32   :  { %v116_v30 = vstv %s239_s14 }
  0x33   :  { %v91_v36 = vstv %s241_s15 }
  0x34   :  { %v119_v37 = vstv %s243_s16 }
  0x35   :  { %v94_v43 = vstv %s245_s17 }
  0x36   :  { %v122_v44 = vstv %s249_s18 }
  0x8f   :  { %v41_v9 = vpop.permute.xlu0 %40  ;;  %v45_v10 = vpop.permute.xlu1 %44 }
  0x90   :  { %v77_v12 = vmul.f32 %v76_v6, %v41_v9  ;;  %v105_v14 = vmul.f32 %v104_v8, %v41_v9  ;;  %v83_v27 = vmul.f32 %v82_v17, %v45_v10  ;;  %v111_v28 = vmul.f32 %v110_v18, %v45_v10 }
  0x92   :  { %v78_v23 = vadd.f32 %v77_v12, %v75_v11  ;;  %v106_v24 = vadd.f32 %v105_v14, %v103_v13 }
  0x93   :  { %v43_v19 = vpop.permute.xlu0 %42  ;;  %v47_v22 = vpop.permute.xlu1 %46 }
  0x94   :  { %v80_v25 = vmul.f32 %v79_v15, %v43_v19  ;;  %v108_v26 = vmul.f32 %v107_v16, %v43_v19  ;;  %v86_v33 = vmul.f32 %v85_v20, %v47_v22  ;;  %v114_v34 = vmul.f32 %v113_v21, %v47_v22 }
  0x96   :  { %v81_v31 = vadd.f32 %v80_v25, %v78_v23  ;;  %v109_v32 = vadd.f32 %v108_v26, %v106_v24 }
  0x97   :  { %v49_v35 = vpop.permute.xlu0 %48  ;;  %v51_v38 = vpop.permute.xlu1 %50 }
  0x98   :  { %v84_v39 = vadd.f32 %v83_v27, %v81_v31  ;;  %v112_v40 = vadd.f32 %v111_v28, %v109_v32  ;;  %v89_v41 = vmul.f32 %v88_v29, %v49_v35  ;;  %v117_v42 = vmul.f32 %v116_v30, %v49_v35 }
  0x99   :  { %v92_v47 = vmul.f32 %v91_v36, %v51_v38  ;;  %v120_v48 = vmul.f32 %v119_v37, %v51_v38 }
  0x9a   :  { %v87_v45 = vadd.f32 %v86_v33, %v84_v39  ;;  %v115_v46 = vadd.f32 %v114_v34, %v112_v40 }
  0x9b   :  { %v53_v49 = vpop.permute.xlu0 %52 }
  0x9c   :  { %v90_v50 = vadd.f32 %v89_v41, %v87_v45  ;;  %v118_v51 = vadd.f32 %v117_v42, %v115_v46  ;;  %v95_v52 = vmul.f32 %v94_v43, %v53_v49  ;;  %v123_v53 = vmul.f32 %v122_v44, %v53_v49 }
  0x9e   :  { %v93_v54 = vadd.f32 %v92_v47, %v90_v50  ;;  %v121_v55 = vadd.f32 %v120_v48, %v118_v51 }
  0xa0   :  { %v96_v56 = vadd.f32 %v95_v52, %v93_v54  ;;  %v124_v57 = vadd.f32 %v123_v53, %v121_v55 }
  0xa2   :  { %v97_v58 = vmax.f32 %v96_v56, 0.0  ;;  %v125_v59 = vmax.f32 %v124_v57, 0.0 }
  0xa4   :  { %v98_v60 = vmin.f32 %v97_v58, 6.0  ;;  %v126_v61 = vmin.f32 %v125_v59, 6.0 }
  0xa6   :  { %99 = vst [vmem:[%s270_s3] sm:$0x1] %v98_v60  ;;  %127 = vst [vmem:[%s270_s3 + $0x1] sm:$0x1] %v126_v61 }
  0xa7   :  { %132 = vsyncpa [#allocation3], 1 }
  0xa8   :  { %133 = vsyncpa [#allocation5], 1 }

</bundles_post_ra>
